<compile_context>
chip_gen: v7x
topology: tpu7x:2x2x1
jax: 0.10.0
libtpu: 0.0.40
codegen_flags: <defaults>
</compile_context>

<pallas_src>
import functools

import jax
import jax.numpy as jnp
from jax.experimental import pallas as pl
from jax.experimental.pallas import tpu as pltpu

# ---- problem sizes (small, consistent with the module's shape conventions) ----
BATCH = 8                   # n  batch size
NUM_STEPS = 8               # m  number of hedging time steps (td.indices)
ASSET_DIM = 2               # d  tradable assets
INFO_DIM = 1 + ASSET_DIM    # d' = [time, S_t]
HIDDEN = 32                 # strategy-net hidden width
MATURITY = 1.0
STRIKE = 1.0
DT = MATURITY / NUM_STEPS
TIME_GRID = tuple(k * DT for k in range(NUM_STEPS + 1))
NT = BATCH * NUM_STEPS      # flattened (sample, step) rows, row = n*T + k


def _round8(x):
    return (x + 7) // 8 * 8


# ---- packed-parameter row layout: one (P_ROWS, HIDDEN) f32 buffer, every ------
# ---- segment start aligned to an 8-row sublane tile ---------------------------
R_TB = 0                               # [R_TB , R_W1S): per-row time bias  (NT, H)
R_W1S = R_TB + NT                      # [R_W1S, R_W2 ): W1_assets          (D, H)
R_W2 = R_W1S + _round8(ASSET_DIM)      # [R_W2 , R_B2 ): W2                 (H, H)
R_B2 = R_W2 + HIDDEN                   #  R_B2         : b2                 (1, H)
R_W3 = R_B2 + _round8(1)               # [R_W3 , R_B3 ): W3 (cols 0:D used) (H, H)
R_B3 = R_W3 + HIDDEN                   #  R_B3         : b3 (cols 0:D used) (1, H)
P_ROWS = R_B3 + _round8(1)             # = 152 rows

# ---- training data-slab row layout: [cur; nxt; S_T], all starts 8-aligned -----
D_CUR = 0                              # S_k      for all (n, k), (NT, D)
D_NXT = NT                             # S_{k+1}  for all (n, k), (NT, D)
D_TERM = 2 * NT                        # S_T      per sample,     (N,  D)
DATA_ROWS = 2 * NT + BATCH


# --------------------------------- kernels --------------------------------------
def _strategy_mlp(prices, p):
    """StrategyNet applied to every (n, k) pair at once.

    prices: (NT, D) asset prices S_k, rows ordered n-major / k-minor.
    p:      (P_ROWS, H) packed parameters (time bias pre-expanded per row).
    Returns (NT, D) strategies.  3 matmuls + 2 tanh, no broadcasts/relayouts.
    """
    tb = p[R_TB:R_TB + NT, :]                       # (NT, H) = t_k*W1_time + b1
    w1s = p[R_W1S:R_W1S + ASSET_DIM, :]             # (D, H)
    w2 = p[R_W2:R_W2 + HIDDEN, :]                   # (H, H)
    b2 = p[R_B2:R_B2 + 1, :]                        # (1, H)
    w3 = p[R_W3:R_W3 + HIDDEN, 0:ASSET_DIM]         # (H, D)
    b3 = p[R_B3:R_B3 + 1, 0:ASSET_DIM]              # (1, D)

    h1 = jnp.tanh(jnp.dot(prices, w1s, preferred_element_type=jnp.float32) + tb)
    h2 = jnp.tanh(jnp.dot(h1, w2, preferred_element_type=jnp.float32) + b2)
    return jnp.dot(h2, w3, preferred_element_type=jnp.float32) + b3


def deep_hedge_pnl_kernel(data_ref, p_ref, pnl_ref):
    """training=True path: only the PnL is computed / stored."""
    data = data_ref[...]                                   # (2*NT + N, D)
    cur = data[D_CUR:D_CUR + NT, :]                        # (NT, D)  S_k
    nxt = data[D_NXT:D_NXT + NT, :]                        # (NT, D)  S_{k+1}
    term = data[D_TERM:D_TERM + BATCH, :]                  # (N, D)   S_T

    strat = _strategy_mlp(cur, p_ref[...])                 # (NT, D)

    # _update_wealth for all steps at once: sum_k strat * (S_{k+1} - S_k)
    gains = strat * (nxt - cur)                            # (NT, D)
    # T == 8 rows per sample -> this reshape is sublane-tile aligned (free).
    wealth2d = jnp.sum(gains.reshape(BATCH, NUM_STEPS, ASSET_DIM), axis=1)  # (N, D)

    # _calculate_profit_and_loss: basket-of-calls payoff on S_T; single final
    # lane reduction handles both the per-asset wealth sum and the payoff sum.
    payoff2d = jnp.maximum(term - STRIKE, 0.0)             # (N, D)
    pnl = jnp.sum(wealth2d - payoff2d, axis=1)             # (N,)
    pnl_ref[...] = pnl.reshape(1, BATCH)                   # lane-dense row store


def deep_hedge_strategy_kernel(cur_ref, p_ref, strat_ref):
    """training=False path: only the strategies are computed / stored (one slab)."""
    strat_ref[...] = _strategy_mlp(cur_ref[...], p_ref[...])


# --------------------------------- wrapper --------------------------------------
def _pack_params(params):
    """Fold the time column of layer 1 into a fully expanded per-row bias table
    and coalesce all weights/biases into one (P_ROWS, HIDDEN) buffer so the
    kernel needs exactly one parameter DMA and zero in-kernel broadcasts."""
    tgrid = jnp.asarray(TIME_GRID[:NUM_STEPS], jnp.float32)[:, None]     # (T, 1)
    tbias = tgrid * params["w1"][0:1, :] + params["b1"]                  # (T, H)
    tb_full = jnp.tile(tbias, (BATCH, 1))                                # (NT, H) row = n*T + k

    packed = jnp.zeros((P_ROWS, HIDDEN), jnp.float32)
    packed = packed.at[R_TB:R_TB + NT, :].set(tb_full)
    packed = packed.at[R_W1S:R_W1S + ASSET_DIM, :].set(params["w1"][1:, :])
    packed = packed.at[R_W2:R_W2 + HIDDEN, :].set(params["w2"])
    packed = packed.at[R_B2:R_B2 + 1, :].set(params["b2"])
    packed = packed.at[R_W3:R_W3 + HIDDEN, 0:ASSET_DIM].set(params["w3"])
    packed = packed.at[R_B3:R_B3 + 1, 0:ASSET_DIM].set(params["b3"])
    return packed


@functools.partial(jax.jit, static_argnames=("training",))
def deep_hedge_forward(inputs, params, training=True):
    """inputs: (n, m+1, d) asset-price paths, native PyTorch batch-major layout.
    All reshapes below are wrapper-side layout plumbing (XLA), not compute."""
    paths = inputs.astype(jnp.float32)
    packed = _pack_params(params)
    vmem = pl.BlockSpec(memory_space=pltpu.MemorySpace.VMEM)

    cur = paths[:, :NUM_STEPS, :].reshape(NT, ASSET_DIM)        # row = n*T + k

    # Scaling note (not needed at toy sizes): for production batch sizes add a
    # grid over the row dimension with a large "parallel" block (>=512 rows),
    # budget the tile against 16/32 MiB scoped VMEM on v5e/v6e (64 MiB physical
    # on v7x) and set pltpu.CompilerParams(vmem_limit_bytes=...) accordingly.
    if training:
        nxt = paths[:, 1:, :].reshape(NT, ASSET_DIM)
        term = paths[:, NUM_STEPS, :]
        data = jnp.concatenate([cur, nxt, term], axis=0)        # (2*NT+N, D) one DMA
        pnl = pl.pallas_call(
            deep_hedge_pnl_kernel,
            in_specs=[vmem, vmem],
            out_specs=vmem,
            out_shape=jax.ShapeDtypeStruct((1, BATCH), jnp.float32),
        )(data, packed)
        return pnl[0]                                           # (n,)

    strat = pl.pallas_call(
        deep_hedge_strategy_kernel,
        in_specs=[vmem, vmem],
        out_specs=vmem,
        out_shape=jax.ShapeDtypeStruct((NT, ASSET_DIM), jnp.float32),
    )(cur, packed)
    return strat.reshape(BATCH, NUM_STEPS, ASSET_DIM)           # free reshape (n, m, d)


# ------------------------------ init & reference --------------------------------
def init_params(key):
    """Deterministic StrategyNet parameter init (PyTorch-Linear-style uniform)."""
    ks = jax.random.split(key, 6)

    def lin(kw, kb, fan_in, fan_out):
        bound = 1.0 / jnp.sqrt(jnp.float32(fan_in))
        w = jax.random.uniform(kw, (fan_in, fan_out), jnp.float32, -bound, bound)
        b = jax.random.uniform(kb, (1, fan_out), jnp.float32, -bound, bound)
        return w, b

    w1, b1 = lin(ks[0], ks[1], INFO_DIM, HIDDEN)
    w2, b2 = lin(ks[2], ks[3], HIDDEN, HIDDEN)
    w3, b3 = lin(ks[4], ks[5], HIDDEN, ASSET_DIM)
    return {"w1": w1, "b1": b1, "w2": w2, "b2": b2, "w3": w3, "b3": b3}


def deep_hedge_reference(inputs, params, training=True):
    """Pure-JAX reference mirroring the original per-step forward loop."""
    paths = inputs.astype(jnp.float32)
    n = paths.shape[0]
    wealth = jnp.zeros((n,), jnp.float32)
    strategies = []
    for k in range(NUM_STEPS):
        s_k = paths[:, k, :]
        info = jnp.concatenate(
            [jnp.full((n, 1), TIME_GRID[k], jnp.float32), s_k], axis=-1)
        h1 = jnp.tanh(info @ params["w1"] + params["b1"])
        h2 = jnp.tanh(h1 @ params["w2"] + params["b2"])
        strat = h2 @ params["w3"] + params["b3"]
        strategies.append(strat)
        wealth = wealth + jnp.sum(strat * (paths[:, k + 1, :] - s_k), axis=-1)
    payoff = jnp.sum(jnp.maximum(paths[:, NUM_STEPS, :] - STRIKE, 0.0), axis=-1)
    if training:
        return wealth - payoff
    return jnp.stack(strategies, axis=1)


# ------------------------------------ main ---------------------------------------
if __name__ == "__main__":
    key = jax.random.PRNGKey(0)
    k_path, k_param = jax.random.split(key)

    # Deterministic geometric-Brownian-like asset paths, S_0 = 1.
    sigma, mu = 0.2, 0.0
    dw = jax.random.normal(k_path, (BATCH, NUM_STEPS, ASSET_DIM), jnp.float32)
    log_incr = (mu - 0.5 * sigma ** 2) * DT + sigma * jnp.sqrt(DT) * dw
    log_paths = jnp.concatenate(
        [jnp.zeros((BATCH, 1, ASSET_DIM), jnp.float32),
         jnp.cumsum(log_incr, axis=1)], axis=1)
    inputs = jnp.exp(log_paths)                 # (n, m+1, d) = (8, 9, 2)

    params = init_params(k_param)

    # training mode -> PnL of shape (n,)
    pnl = deep_hedge_forward(inputs, params, training=True)
    jax.block_until_ready(pnl)
    # eval mode -> strategies of shape (n, m, d)
    strat = deep_hedge_forward(inputs, params, training=False)
    jax.block_until_ready(strat)

    # correctness vs. pure-JAX reference of the original per-step formulation
    pnl_ref = deep_hedge_reference(inputs, params, training=True)
    strat_ref = deep_hedge_reference(inputs, params, training=False)
    assert pnl.shape == (BATCH,)
    assert strat.shape == (BATCH, NUM_STEPS, ASSET_DIM)
    assert jnp.allclose(pnl, pnl_ref, atol=1e-5, rtol=1e-5)
    assert jnp.allclose(strat, strat_ref, atol=1e-5, rtol=1e-5)

    print("KERNEL_OK")
</pallas_src>

<mosaic_0001>
module attributes {stable_mosaic.version = 11 : i64} {
  func.func @deep_hedge_pnl_kernel(%arg0: memref<136x2xf32, #tpu.memory_space<vmem>>, %arg1: memref<152x32xf32, #tpu.memory_space<vmem>>, %arg2: memref<1x8xf32, #tpu.memory_space<vmem>>) attributes {dimension_semantics = [], scalar_prefetch = 0 : i64, scratch_operands = 0 : i64, tpu.core_type = #tpu.core_type<tc>} {
    %c0 = arith.constant 0 : index
    %c0_0 = arith.constant 0 : index
    %0 = vector.load %arg0[%c0, %c0_0] : memref<136x2xf32, #tpu.memory_space<vmem>>, vector<136x2xf32>
    %1 = vector.extract_strided_slice %0 {offsets = [0, 0], sizes = [64, 2], strides = [1, 1]} : vector<136x2xf32> to vector<64x2xf32>
    %2 = vector.extract_strided_slice %0 {offsets = [64, 0], sizes = [64, 2], strides = [1, 1]} : vector<136x2xf32> to vector<64x2xf32>
    %3 = vector.extract_strided_slice %0 {offsets = [128, 0], sizes = [8, 2], strides = [1, 1]} : vector<136x2xf32> to vector<8x2xf32>
    %c0_1 = arith.constant 0 : index
    %c0_2 = arith.constant 0 : index
    %4 = vector.load %arg1[%c0_1, %c0_2] : memref<152x32xf32, #tpu.memory_space<vmem>>, vector<152x32xf32>
    %5 = vector.extract_strided_slice %4 {offsets = [0, 0], sizes = [64, 32], strides = [1, 1]} : vector<152x32xf32> to vector<64x32xf32>
    %6 = vector.extract_strided_slice %4 {offsets = [64, 0], sizes = [2, 32], strides = [1, 1]} : vector<152x32xf32> to vector<2x32xf32>
    %7 = vector.extract_strided_slice %4 {offsets = [72, 0], sizes = [32, 32], strides = [1, 1]} : vector<152x32xf32> to vector<32x32xf32>
    %8 = vector.extract_strided_slice %4 {offsets = [104, 0], sizes = [1, 32], strides = [1, 1]} : vector<152x32xf32> to vector<1x32xf32>
    %9 = vector.extract_strided_slice %4 {offsets = [112, 0], sizes = [32, 2], strides = [1, 1]} : vector<152x32xf32> to vector<32x2xf32>
    %10 = vector.extract_strided_slice %4 {offsets = [144, 0], sizes = [1, 2], strides = [1, 1]} : vector<152x32xf32> to vector<1x2xf32>
    %cst = arith.constant dense<0.000000e+00> : vector<64x32xf32>
    %11 = tpu.matmul %1, %6, %cst {dimension_numbers = #tpu.dot_dimension_numbers<[1], [0], [0], [1], [0, 0, 1, 1], [], []>} : vector<64x2xf32>, vector<2x32xf32>, vector<64x32xf32> -> vector<64x32xf32>
    %12 = arith.addf %11, %5 : vector<64x32xf32>
    %13 = math.tanh %12 : vector<64x32xf32>
    %cst_3 = arith.constant dense<0.000000e+00> : vector<64x32xf32>
    %14 = tpu.matmul %13, %7, %cst_3 {dimension_numbers = #tpu.dot_dimension_numbers<[1], [0], [0], [1], [0, 0, 1, 1], [], []>} : vector<64x32xf32>, vector<32x32xf32>, vector<64x32xf32> -> vector<64x32xf32>
    %15 = vector.broadcast %8 : vector<1x32xf32> to vector<64x32xf32>
    %16 = arith.addf %14, %15 : vector<64x32xf32>
    %17 = math.tanh %16 : vector<64x32xf32>
    %cst_4 = arith.constant dense<0.000000e+00> : vector<64x2xf32>
    %18 = tpu.matmul %17, %9, %cst_4 {dimension_numbers = #tpu.dot_dimension_numbers<[1], [0], [0], [1], [0, 0, 1, 1], [], []>} : vector<64x32xf32>, vector<32x2xf32>, vector<64x2xf32> -> vector<64x2xf32>
    %19 = vector.broadcast %10 : vector<1x2xf32> to vector<64x2xf32>
    %20 = arith.addf %18, %19 : vector<64x2xf32>
    %21 = arith.subf %2, %1 : vector<64x2xf32>
    %22 = arith.mulf %20, %21 : vector<64x2xf32>
    %23 = vector.shape_cast %22 : vector<64x2xf32> to vector<8x8x2xf32>
    %cst_5 = arith.constant dense<0.000000e+00> : vector<8x2xf32>
    %24 = vector.multi_reduction <add>, %23, %cst_5 [1] : vector<8x8x2xf32> to vector<8x2xf32>
    %cst_6 = arith.constant 1.000000e+00 : f32
    %25 = vector.broadcast %cst_6 : f32 to vector<8x2xf32>
    %26 = arith.subf %3, %25 : vector<8x2xf32>
    %cst_7 = arith.constant 0.000000e+00 : f32
    %27 = vector.broadcast %cst_7 : f32 to vector<8x2xf32>
    %28 = arith.maximumf %26, %27 : vector<8x2xf32>
    %29 = arith.subf %24, %28 : vector<8x2xf32>
    %cst_8 = arith.constant dense<0.000000e+00> : vector<8xf32>
    %30 = vector.multi_reduction <add>, %29, %cst_8 [1] : vector<8x2xf32> to vector<8xf32>
    %31 = vector.shape_cast %30 : vector<8xf32> to vector<1x8xf32>
    %c0_9 = arith.constant 0 : index
    %c0_10 = arith.constant 0 : index
    %32 = vector.load %arg2[%c0_9, %c0_10] : memref<1x8xf32, #tpu.memory_space<vmem>>, vector<1x8xf32>
    tpu.vector_store %arg2[%c0_9, %c0_10], %31 {strides = array<i32>} : memref<1x8xf32, #tpu.memory_space<vmem>>, vector<1x8xf32>,
    return
  }
}

</mosaic_0001>

<bundles_post_ra>
// kernel: deep_hedge_forward.1
= control target key start
LH: loop header
LB: loop body
LE: loop exit
PB: predicated region body
PF: predicated region fallthrough
CT: control target
= control target key end

     0   :  { %vm73_vm0 = vcmask 1041408   ;;  %vm48_vm1 = vcmask 15360   ;;  %s1036_s0 = inlined_call_operand.vmem [shape: f32[136,2], index: 0, kind: input, shape index: {}]   ;;  %s1037_s1 = inlined_call_operand.vmem [shape: f32[152,32], index: 1, kind: input, shape index: {}]   ;;  %s1038_s2 = inlined_call_operand.hbm [shape: f32[1,8], index: 2, kind: output, shape index: {}]  }
   0x1   :  { %v37_v0 = vld [vmem:[%s1037_s1 + $0x40] sm:$0xff]  ;;  %v837_v2 = vld [vmem:[%s1036_s0 + $0x8] sm:$0xff]  ;;  %v842_v3 = vld [vmem:[%s1036_s0 + $0x10] sm:$0xff] }
   0x2   :  { %v830_v1 = vld [vmem:[%s1036_s0] sm:$0xff]  ;;  %679 = vmatprep.subr.msk.mxu0 %vm73_vm0, %v37_v0  ;;  %749 = vmatprep.subr.msk.mxu1 %vm73_vm0, %v37_v0  ;;  %v852_v5 = vld [vmem:[%s1036_s0 + $0x28] sm:$0xff]  ;;  %v859_v6 = vld [vmem:[%s1036_s0 + $0x30] sm:$0xff] }
   0x3   :  { %681 = vmatprep.mubr.msk.f32.mxu0 %vm48_vm1, %v830_v1  ;;  %680 = vmatpush3.msk.msra.mxu0 %vm73_vm0, %v37_v0  ;;  %v847_v4 = vld [vmem:[%s1036_s0 + $0x20] sm:$0xff]  ;;  %v866_v7 = vld [vmem:[%s1036_s0 + $0x18] sm:$0xff] }
   0x4   :  { %682 = vmatmul.mubr.msk.f32.vlgmr.msra.gmra.mrb[0].mxu0 %vm48_vm1, %v837_v2  ;;  %750 = vmatpush3.msk.msra.mxu1 %vm73_vm0, %v37_v0 }
   0x5   :  { %684 = vmatprep.mubr.msk.f32.mxu0 %vm48_vm1, %v842_v3  ;;  %687 = vmatprep.mubr.msk.f32.mxu1 %vm48_vm1, %v847_v4 }
   0x6   :  { %7 = vsyncpa [#allocation3], 0  ;;  %688 = vmatmul.mubr.msk.f32.vlgmr.msra.gmra.mrb[0].mxu1 %vm48_vm1, %v852_v5  ;;  %v877_v8 = vld [vmem:[%s1036_s0 + $0x38] sm:$0xff]  ;;  %v38_v9 = vld [vmem:[%s1037_s1 + $0x48] sm:$0xff]  ;;  %vm194_vm2 = vcmask 261120   ;;  %v190_v53 = vlaneseq  ;;  %vm572_vm3 = vcmask 1041409  }
   0x7   :  { %690 = vmatprep.mubr.msk.f32.mxu1 %vm48_vm1, %v859_v6  ;;  %v39_v10 = vld [vmem:[%s1037_s1 + $0x50] sm:$0xff]  ;;  %v40_v12 = vld [vmem:[%s1037_s1 + $0x58] sm:$0xff]  ;;  %v41_v13 = vld [vmem:[%s1037_s1 + $0x60] sm:$0xff]  ;;  %vm575_vm4 = vcmask 1042434   ;;  %vm578_vm5 = vcmask 1043459   ;;  %vm581_vm6 = vcmask 1044484  }
   0x8   :  { %685 = vmatmul.mubr.msk.f32.gmra.mrb[2].mxu0 %vm48_vm1, %v866_v7  ;;  %v733_v11 = vpack.c.bf16 %v39_v10, %v38_v9  ;;  %v737_v14 = vpack.c.bf16 %v41_v13, %v40_v12  ;;  %v30_v15 = vld [vmem:[%s1037_s1 + $0x8] sm:$0xff]  ;;  %v29_v16 = vld [vmem:[%s1037_s1] sm:$0xff]  ;;  %v32_v22 = vld [vmem:[%s1037_s1 + $0x18] sm:$0xff]  ;;  %v940_v54 = vshrl.u32 %v190_v53, 7  ;;  %vm584_vm7 = vcmask 1045509  }
   0x9   :  { %v33_v20 = vld [vmem:[%s1037_s1 + $0x20] sm:$0xff]  ;;  %v31_v24 = vld [vmem:[%s1037_s1 + $0x10] sm:$0xff]  ;;  %v34_v32 = vld [vmem:[%s1037_s1 + $0x28] sm:$0xff]  ;;  %vm587_vm8 = vcmask 1046534   ;;  %vm590_vm9 = vcmask 1047559   ;;  %vm604_vm10 = vcmask 57344  }
   0xa   :  { %691 = vmatmul.mubr.msk.f32.gmra.mrb[2].mxu1 %vm48_vm1, %v877_v8  ;;  %734 = vmatprep.subr.bf16.mxu1 %v733_v11  ;;  %v35_v30 = vld [vmem:[%s1037_s1 + $0x30] sm:$0xff]  ;;  %v36_v37 = vld [vmem:[%s1037_s1 + $0x38] sm:$0xff]  ;;  %v45_v50 = vld [vmem:[%s1037_s1 + $0x80] sm:$0xff]  ;;  %v192_v55 = vsub.s32 0, %v940_v54 }
   0xb   :  { %736 = vmatpush3.bf16.msra.mxu1 %v733_v11  ;;  %v43_v47 = vld [vmem:[%s1037_s1 + $0x70] sm:$0xff]  ;;  %v44_v48 = vld [vmem:[%s1037_s1 + $0x78] sm:$0xff]  ;;  %v46_v51 = vld [vmem:[%s1037_s1 + $0x88] sm:$0xff] }
   0xc   :  { %738 = vmatprep.subr.bf16.mxu1 %v737_v14  ;;  %v741_v49 = vpack.c.bf16 %v44_v48, %v43_v47  ;;  %v745_v52 = vpack.c.bf16 %v46_v51, %v45_v50  ;;  %v42_v56 = vld [vmem:[%s1037_s1 + $0x68] sm:$0xff] }
   0xd   :  { %v193_v57 = vrot.slane %v42_v56, %v192_v55 }
   0xe   :  { %742 = vmatprep.subr.bf16.mxu0 %v741_v49 }
   0xf   :  { %740 = vmatpush3.bf16.msra.mxu1 %v737_v14  ;;  %744 = vmatpush3.bf16.msra.mxu0 %v741_v49 }
  0x10   :  { %746 = vmatprep.subr.bf16.mxu0 %v745_v52 }
  0x13   :  { %748 = vmatpush3.bf16.msra.mxu0 %v745_v52 }
  0xd7   :  { %v683_v17 = vpop.f32.mrb[0].mxu0 }
  0xd8   :  { %v149_v18 = vadd.f32 %v683_v17, %v30_v15  ;;  %v143_v19 = vpop.f32.mrb[1].mxu0 }
  0xd9   :  { %v144_v21 = vadd.f32 %v143_v19, %v29_v16  ;;  %v689_v23 = vpop.f32.mrb[0].mxu1 }
  0xda   :  { %v163_v25 = vpop.f32.mrb[1].mxu1  ;;  %v169_v36 = vadd.f32 %v689_v23, %v34_v32 }
  0xdb   :  { %752 = vtanh.f32 %v144_v21  ;;  %v686_v26 = vpop.f32.mrb[2].mxu0  ;;  %v164_v27 = vadd.f32 %v163_v25, %v33_v20 }
  0xdc   :  { %754 = vtanh.f32 %v149_v18  ;;  %v159_v28 = vadd.f32 %v686_v26, %v32_v22  ;;  %v153_v29 = vpop.f32.mrb[3].mxu0  ;;  %v47_v26 = vld [vmem:[%s1037_s1 + $0x90] sm:$0xff] }
  0xdd   :  { %v154_v31 = vadd.f32 %v153_v29, %v31_v24  ;;  %v692_v33 = vpop.f32.mrb[2].mxu1  ;;  %756 = vtanh.f32 %v164_v27  ;;  %v21_v27 = vld [vmem:[%s1036_s0 + $0x48] sm:$0xff]  ;;  %v28_v29 = vld [vmem:[%s1036_s0 + $0x80] sm:$0xff] }
  0xde   :  { %v173_v34 = vpop.f32.mrb[3].mxu1  ;;  %v179_v38 = vadd.f32 %v692_v33, %v36_v37 }
  0xdf   :  { %758 = vtanh.f32 %v154_v31  ;;  %v174_v35 = vadd.f32 %v173_v34, %v35_v30  ;;  %v966_v30 = vrot.slane %v47_v26, %v192_v55  ;;  %v466_v31 = vsub.f32 %v21_v27, %v837_v2  ;;  %v24_v2 = vld [vmem:[%s1036_s0 + $0x60] sm:$0xff] }
  0xe0   :  { %760 = vtanh.f32 %v159_v28  ;;  %v20_v28 = vld [vmem:[%s1036_s0 + $0x40] sm:$0xff]  ;;  %v645_v34 = vadd.f32 -1.0, %v28_v29  ;;  %v469_v50 = vsub.f32 %v24_v2, %v847_v4 }
  0xe1   :  { %762 = vtanh.f32 %v174_v35  ;;  %v465_v32 = vsub.f32 %v20_v28, %v830_v1  ;;  %v23_v35 = vld [vmem:[%s1036_s0 + $0x58] sm:$0xff] }
  0xe2   :  { %764 = vtanh.f32 %v169_v36 }
  0xe3   :  { %766 = vtanh.f32 %v179_v38  ;;  %v22_v38 = vld [vmem:[%s1036_s0 + $0x50] sm:$0xff] }
  0xe5   :  { %v753_v39 = vpop.eup %752 }
  0xe6   :  { %v755_v40 = vpop.eup %754  ;;  %701 = vmatprep.mubr.msk.f32.mxu1 %vm194_vm2, %v753_v39 }
  0xe7   :  { %702 = vmatmul.mubr.msk.f32.vlgmr.msra.gmra.mrb[4].mxu1 %vm194_vm2, %v755_v40  ;;  %v757_v41 = vpop.eup %756  ;;  %v468_v40 = vsub.f32 %v23_v35, %v866_v7  ;;  %v26_v7 = vld [vmem:[%s1036_s0 + $0x70] sm:$0xff] }
  0xe9   :  { %v759_v42 = vpop.eup %758 }
  0xea   :  { %v761_v43 = vpop.eup %760  ;;  %704 = vmatprep.mubr.msk.f32.mxu1 %vm194_vm2, %v759_v42 }
  0xeb   :  { %705 = vmatmul.mubr.msk.f32.gmra.mrb[6].mxu1 %vm194_vm2, %v761_v43  ;;  %v763_v44 = vpop.eup %762 }
  0xec   :  { %707 = vmatprep.mubr.msk.f32.mxu1 %vm194_vm2, %v757_v41  ;;  %v765_v45 = vpop.eup %764  ;;  %v982_v41 = vmax.f32 %v645_v34, 0.0 }
  0xed   :  { %v767_v46 = vpop.eup %766 }
  0xef   :  { %708 = vmatmul.mubr.msk.f32.gmra.mrb[8].mxu1 %vm194_vm2, %v765_v45  ;;  %v25_v45 = vld [vmem:[%s1036_s0 + $0x68] sm:$0xff] }
  0xf0   :  { %710 = vmatprep.mubr.msk.f32.mxu1 %vm194_vm2, %v763_v44  ;;  %v467_v44 = vsub.f32 %v22_v38, %v842_v3 }
  0xf3   :  { %711 = vmatmul.mubr.msk.f32.gmra.mrb[10].mxu1 %vm194_vm2, %v767_v46  ;;  %v27_v46 = vld [vmem:[%s1036_s0 + $0x78] sm:$0xff]  ;;  %s808_s0 = smov [#allocation2]  }
  0xf4   :  { %s612_s24 = sshll.u32 %s808_s0, 4  ;;  %s613_s24 = int_to_ptr.vmem [resolvable:$true] %s612_s24 }
  0xf5   :  { %s784_s25 = scalar_lea.vmem %s613_s24, 16  ;;  %s788_s26 = scalar_lea.vmem %s613_s24, 32 }
  0xf6   :  { %p785_p0 = scmp.ne.s32.totalorder %s613_s24, %s784_s25  ;;  %p789_p1 = scmp.lt.s32.totalorder %s613_s24, %s613_s24 }
  0xf7   :  { %p790_p2 = scmp.lt.s32.totalorder %s788_s26, %s784_s25 }
  0xf9   :  { %p791_p3 = por %p790_p2, %p789_p1 }
  0xfb   :  { %p792_p4 = pnand %p791_p3, %p785_p0 }
 0x1ba   :  { %v703_v58 = vpop.f32.mrb[4].mxu1 }
 0x1bb   :  { %v291_v59 = vadd.f32 %v703_v58, %v193_v57  ;;  %v285_v60 = vpop.f32.mrb[5].mxu1  ;;  %v472_v58 = vsub.f32 %v27_v46, %v877_v8 }
 0x1bc   :  { %v286_v61 = vadd.f32 %v285_v60, %v193_v57  ;;  %v540_v60 = vrot.slane %v982_v41, 1 }
 0x1be   :  { %768 = vtanh.f32 %v286_v61  ;;  %v706_v62 = vpop.f32.mrb[6].mxu1 }
 0x1bf   :  { %770 = vtanh.f32 %v291_v59  ;;  %v301_v63 = vadd.f32 %v706_v62, %v193_v57  ;;  %v295_v0 = vpop.f32.mrb[7].mxu1 }
 0x1c0   :  { %v296_v9 = vadd.f32 %v295_v0, %v193_v57 }
 0x1c2   :  { %772 = vtanh.f32 %v296_v9  ;;  %v709_v10 = vpop.f32.mrb[8].mxu1  ;;  %v542_v9 = vrot.slane %v982_v41, 3 }
 0x1c3   :  { %774 = vtanh.f32 %v301_v63  ;;  %v311_v11 = vadd.f32 %v709_v10, %v193_v57  ;;  %v305_v12 = vpop.f32.mrb[9].mxu1  ;;  %v471_v63 = vsub.f32 %v26_v7, %v859_v6 }
 0x1c4   :  { %v306_v13 = vadd.f32 %v305_v12, %v193_v57 }
 0x1c6   :  { %776 = vtanh.f32 %v306_v13  ;;  %v712_v14 = vpop.f32.mrb[10].mxu1 }
 0x1c7   :  { %778 = vtanh.f32 %v311_v11  ;;  %v321_v15 = vadd.f32 %v712_v14, %v193_v57  ;;  %v315_v16 = vpop.f32.mrb[11].mxu1 }
 0x1c8   :  { %v769_v17 = vpop.eup %768  ;;  %v316_v18 = vadd.f32 %v315_v16, %v193_v57  ;;  %v470_v57 = vsub.f32 %v25_v45, %v852_v5  ;;  %v541_v16 = vrot.slane %v982_v41, 2 }
 0x1c9   :  { %v771_v19 = vpop.eup %770  ;;  %721 = vmatprep.mubr.msk.f32.mxu0 %vm194_vm2, %v769_v17 }
 0x1ca   :  { %780 = vtanh.f32 %v316_v18  ;;  %722 = vmatmul.mubr.msk.f32.vlgmr.msra.gmra.mrb[4].mxu0 %vm194_vm2, %v771_v19 }
 0x1cb   :  { %782 = vtanh.f32 %v321_v15 }
 0x1cc   :  { %v773_v20 = vpop.eup %772 }
 0x1cd   :  { %v775_v21 = vpop.eup %774  ;;  %724 = vmatprep.mubr.msk.f32.mxu0 %vm194_vm2, %v773_v20 }
 0x1ce   :  { %725 = vmatmul.mubr.msk.f32.gmra.mrb[6].mxu0 %vm194_vm2, %v775_v21 }
 0x1d0   :  { %v777_v22 = vpop.eup %776 }
 0x1d1   :  { %v779_v23 = vpop.eup %778  ;;  %727 = vmatprep.mubr.msk.f32.mxu0 %vm194_vm2, %v777_v22 }
 0x1d2   :  { %728 = vmatmul.mubr.msk.f32.gmra.mrb[8].mxu0 %vm194_vm2, %v779_v23 }
 0x1d4   :  { %v781_v24 = vpop.eup %780 }
 0x1d5   :  { %v783_v25 = vpop.eup %782  ;;  %730 = vmatprep.mubr.msk.f32.mxu0 %vm194_vm2, %v781_v24 }
 0x1d6   :  { %731 = vmatmul.mubr.msk.f32.gmra.mrb[10].mxu0 %vm194_vm2, %v783_v25 }
 0x29d   :  { %v723_v33 = vpop.f32.mrb[4].mxu0 }
 0x29e   :  { %v432_v36 = vadd.f32 %v723_v33, %v966_v30  ;;  %v426_v37 = vpop.f32.mrb[5].mxu0 }
 0x29f   :  { %v427_v39 = vadd.f32 %v426_v37, %v966_v30 }
 0x2a0   :  { %v474_v1 = vmul.f32 %v466_v31, %v432_v36 }
 0x2a1   :  { %v473_v42 = vmul.f32 %v465_v32, %v427_v39  ;;  %v726_v43 = vpop.f32.mrb[6].mxu0 }
 0x2a2   :  { %v488_v47 = vsel %vm48_vm1, %v474_v1, 0.0  ;;  %v442_v48 = vadd.f32 %v726_v43, %v966_v30  ;;  %v436_v49 = vpop.f32.mrb[7].mxu0 }
 0x2a3   :  { %v489_v3 = vrot.slane %v488_v47, 4  ;;  %v481_v51 = vsel %vm48_vm1, %v473_v42, 0.0  ;;  %v437_v52 = vadd.f32 %v436_v49, %v966_v30 }
 0x2a4   :  { %v482_v55 = vrot.slane %v481_v51, 4  ;;  %v476_v56 = vmul.f32 %v468_v40, %v442_v48 }
 0x2a5   :  { %v490_v59 = vadd.f32 %v489_v3, %v488_v47  ;;  %v475_v61 = vmul.f32 %v467_v44, %v437_v52  ;;  %v729_v62 = vpop.f32.mrb[8].mxu0 }
 0x2a6   :  { %v483_v0 = vadd.f32 %v482_v55, %v481_v51  ;;  %v502_v4 = vsel %vm48_vm1, %v476_v56, 0.0  ;;  %v452_v10 = vadd.f32 %v729_v62, %v966_v30  ;;  %v446_v11 = vpop.f32.mrb[9].mxu0  ;;  %v544_v56 = vrot.slane %v982_v41, 5 }
 0x2a7   :  { %v491_v12 = vrot.slane %v490_v59, 2  ;;  %v503_v13 = vrot.slane %v502_v4, 4  ;;  %v495_v5 = vsel %vm48_vm1, %v475_v61, 0.0  ;;  %v447_v8 = vadd.f32 %v446_v11, %v966_v30 }
 0x2a8   :  { %v484_v14 = vrot.slane %v483_v0, 2  ;;  %v496_v15 = vrot.slane %v495_v5, 4  ;;  %v478_v17 = vmul.f32 %v470_v57, %v452_v10 }
 0x2a9   :  { %v492_v6 = vadd.f32 %v491_v12, %v490_v59  ;;  %v504_v18 = vadd.f32 %v503_v13, %v502_v4  ;;  %v477_v19 = vmul.f32 %v469_v50, %v447_v8  ;;  %v732_v20 = vpop.f32.mrb[10].mxu0 }
 0x2aa   :  { %v485_v21 = vadd.f32 %v484_v14, %v483_v0  ;;  %v497_v22 = vadd.f32 %v496_v15, %v495_v5  ;;  %v516_v23 = vsel %vm48_vm1, %v478_v17, 0.0  ;;  %v462_v24 = vadd.f32 %v732_v20, %v966_v30  ;;  %v456_v25 = vpop.f32.mrb[11].mxu0 }
 0x2ab   :  { %v493_v26 = vrot.slane %v492_v6, 1  ;;  %v505_v27 = vrot.slane %v504_v18, 2  ;;  %v517_v28 = vrot.slane %v516_v23, 4  ;;  %v509_v29 = vsel %vm48_vm1, %v477_v19, 0.0 }
 0x2ac   :  { %v486_v31 = vrot.slane %v485_v21, 1  ;;  %v498_v32 = vrot.slane %v497_v22, 2  ;;  %v510_v33 = vrot.slane %v509_v29, 4  ;;  %v480_v34 = vmul.f32 %v472_v58, %v462_v24 }
 0x2ad   :  { %v494_v35 = vadd.f32 %v493_v26, %v492_v6  ;;  %v506_v36 = vadd.f32 %v505_v27, %v504_v18  ;;  %v518_v37 = vadd.f32 %v517_v28, %v516_v23  ;;  %v457_v38 = vadd.f32 %v456_v25, %v966_v30 }
 0x2ae   :  { %v487_v39 = vadd.f32 %v486_v31, %v485_v21  ;;  %v499_v2 = vadd.f32 %v498_v32, %v497_v22  ;;  %v511_v1 = vadd.f32 %v510_v33, %v509_v29  ;;  %v530_v40 = vsel %vm48_vm1, %v480_v34, 0.0 }
 0x2af   :  { %v556_v42 = vsub.f32 %v494_v35, %v540_v60  ;;  %v507_v43 = vrot.slane %v506_v36, 1  ;;  %v519_v44 = vrot.slane %v518_v37, 2  ;;  %v531_v45 = vrot.slane %v530_v40, 4 }
 0x2b0   :  { %v555_v46 = vsub.f32 %v487_v39, %v982_v41  ;;  %v500_v47 = vrot.slane %v499_v2, 1  ;;  %v512_v48 = vrot.slane %v511_v1, 2  ;;  %v479_v49 = vmul.f32 %v471_v63, %v457_v38 }
 0x2b1   :  { %v571_v7 = vrot.slane %v556_v42, 7  ;;  %v508_v50 = vadd.f32 %v507_v43, %v506_v36  ;;  %v520_v3 = vadd.f32 %v519_v44, %v518_v37  ;;  %v532_v51 = vadd.f32 %v531_v45, %v530_v40 }
 0x2b2   :  { %v501_v52 = vadd.f32 %v500_v47, %v499_v2  ;;  %v513_v30 = vadd.f32 %v512_v48, %v511_v1  ;;  %v523_v55 = vsel %vm48_vm1, %v479_v49, 0.0  ;;  %v543_v0 = vrot.slane %v982_v41, 4 }
 0x2b3   :  { %v558_v57 = vsub.f32 %v508_v50, %v542_v9  ;;  %v521_v58 = vrot.slane %v520_v3, 1  ;;  %v533_v59 = vrot.slane %v532_v51, 2  ;;  %v524_v60 = vrot.slane %v523_v55, 4 }
 0x2b4   :  { %v557_v61 = vsub.f32 %v501_v52, %v541_v16  ;;  %v514_v62 = vrot.slane %v513_v30, 1  ;;  %v573_v63 = vsel %vm572_vm3, %v571_v7, %v555_v46  ;;  %v546_v19 = vrot.slane %v982_v41, 7 }
 0x2b5   :  { %v522_v4 = vadd.f32 %v521_v58, %v520_v3  ;;  %v534_v10 = vadd.f32 %v533_v59, %v532_v51  ;;  %v525_v11 = vadd.f32 %v524_v60, %v523_v55  ;;  %v577_v5 = vrot.slane %v558_v57, 5 }
 0x2b6   :  { %v574_v12 = vrot.slane %v557_v61, 6  ;;  %v515_v13 = vadd.f32 %v514_v62, %v513_v30  ;;  %v545_v22 = vrot.slane %v982_v41, 6  ;;  %v598_v35 = vand.u32 127, %v190_v53 }
 0x2b7   :  { %v535_v8 = vrot.slane %v534_v10, 1  ;;  %v526_v14 = vrot.slane %v525_v11, 2  ;;  %v560_v9 = vsub.f32 %v522_v4, %v544_v56 }
 0x2b8   :  { %v559_v15 = vsub.f32 %v515_v13, %v543_v0  ;;  %v576_v17 = vsel %vm575_vm4, %v574_v12, %v573_v63  ;;  %v601_v36 = vsub.s32 %v598_v35, %v940_v54 }
 0x2b9   :  { %v527_v6 = vadd.f32 %v526_v14, %v525_v11  ;;  %v579_v16 = vsel %vm578_vm5, %v577_v5, %v576_v17  ;;  %v536_v18 = vadd.f32 %v535_v8, %v534_v10  ;;  %v583_v23 = vrot.slane %v560_v9, 3 }
 0x2ba   :  { %v580_v20 = vrot.slane %v559_v15, 4 }
 0x2bb   :  { %v528_v21 = vrot.slane %v527_v6, 1  ;;  %v562_v27 = vsub.f32 %v536_v18, %v546_v19 }
 0x2bc   :  { %v582_v24 = vsel %vm581_vm6, %v580_v20, %v579_v16 }
 0x2bd   :  { %v529_v25 = vadd.f32 %v528_v21, %v527_v6  ;;  %v585_v26 = vsel %vm584_vm7, %v583_v23, %v582_v24  ;;  %v589_v31 = vrot.slane %v562_v27, 1 }
 0x2bf   :  { %v561_v28 = vsub.f32 %v529_v25, %v545_v22 }
 0x2c1   :  { %v586_v29 = vrot.slane %v561_v28, 2 }
 0x2c3   :  { %v588_v32 = vsel %vm587_vm8, %v586_v29, %v585_v26 }
 0x2c4   :  { %v591_v33 = vsel %vm590_vm9, %v589_v31, %v588_v32 }
 0x2c5   :  { %v593_v34 = vsel %vm48_vm1, %v591_v33, 0.0 }
 0x2c6   :  { %594 = vadd.xlane.f32.xlu0 %v593_v34 }
 0x353   :  { %v595_v41 = vpop.xlane.xlu0 %594 }
 0x354   :  { %v602_v37 = vrot.slane %v595_v41, %v601_v36 }
 0x356   :  { %605 = vst.msk [vmem:[#allocation2] sm:$0x1] %vm604_vm10, %v602_v37 }
 0x357   :  { %795 = shalt.err (!%p792_p4)
}
 0x358   :  { %s796_s29 = scalar_lea.hbm %s1038_s2, 16 }
 0x359   :  { %p797_p5 = scmp.ne.s32.totalorder %s1038_s2, %s796_s29  ;;  %p800_p6 = scmp.lt.u32.totalorder %s796_s29, %s1038_s2 }
 0x35b   :  { %p802_p7 = pnand %p800_p6, %p797_p5 }
 0x35d   :  { %805 = shalt.err (!%p802_p7)
}
 0x35e   :  { %615 = dma.vmem_to_hbm [thread:$0]  %s613_s24, 16, %s1038_s2, [#allocation3]  }
 0x35f   :  { %806 = dma.done.wait [#allocation3], 16  }
 0x360   :  { %807 = vsyncadd [#allocation3], 4294967280 }
 0x361   :  { %619 = vsyncpa [#allocation3], 1 }

</bundles_post_ra>
